<compile_context>
chip_gen: v7x
topology: tpu7x:2x2x1
jax: 0.10.0
libtpu: 0.0.40
codegen_flags: <defaults>
</compile_context>

<pallas_src>
import functools

import jax
import jax.numpy as jnp
from jax.scipy.linalg import block_diag
from jax.experimental import pallas as pl
from jax.experimental.pallas import tpu as pltpu


def _round_up(x, m):
    return ((x + m - 1) // m) * m


def fcn_kernel(bc_ref, x_ref, sconv_ref, w1b_ref, mbf_ref, y_ref):
    # bc_ref   : SMEM (1,)                  conv bias scalar
    # x_ref    : VMEM (rb, PACK*C*L)        PACK batch rows packed per sublane row (lane-dense)
    # sconv_ref: VMEM (PACK*C*L, PACK*L)    block-diag conv-select matrix (conv weight folded in)
    # w1b_ref  : VMEM (PACK*L+1, PACK*F)    block-diag Linear1 weight, last row = tiled bias
    # mbf_ref  : VMEM (PACK*F+1, PACK*L)    block-diag (w2 @ ns_t), last row = tiled (b2 @ ns_t)
    # y_ref    : VMEM (rb, PACK*L)          PACK output rows packed per sublane row (lane-dense)
    kw = w1b_ref.shape[0] - 1
    kf = mbf_ref.shape[0] - 1

    # Conv1d(C -> 1, k=1) + the rows-in-lanes packing in ONE MXU matmul: lane segment q of
    # result row r holds the conv output of batch row PACK*r+q.  Everything downstream
    # (VALU adds/ReLUs, the two small matmuls, and the output store) is 128-lane dense.
    h = jnp.dot(x_ref[...], sconv_ref[...], preferred_element_type=jnp.float32)
    h = jnp.maximum(h + bc_ref[0], 0.0)                   # ReLU; Flatten is a no-op (1 channel)

    # Linear(L -> F) + ReLU; block-diagonal weight keeps the packed segments independent.
    g = jnp.dot(h, w1b_ref[:kw, :], preferred_element_type=jnp.float32) + w1b_ref[kw:, :]
    g = jnp.maximum(g, 0.0)                               # (rb, PACK*F)

    # Folded Linear(F -> D) @ nullspace.T (M = w2 @ ns_t), block-diagonal, bias row folded in.
    y_ref[...] = (jnp.dot(g, mbf_ref[:kf, :], preferred_element_type=jnp.float32)
                  + mbf_ref[kf:, :])


@functools.partial(jax.jit, static_argnames=("block_b",))
def fcn_forward(x, params, block_b=4096):
    """x: (B, C, L) float32 (PyTorch Conv1d NCL layout). No wrapper-side transpose of x."""
    wc, bc, w1, b1, w2, b2, ns_t = params
    B, C, L = x.shape
    Fn = w1.shape[1]

    # How many batch rows get folded into the 128-lane dimension (4 when L == 32).
    pack = 128 // L if (L <= 128 and 128 % L == 0) else 1

    # ---- one-time parameter folding / packing (param prep, not per-sample compute) ----
    m_fold = w2 @ ns_t                                                  # (F, L)
    b_fold = b2 @ ns_t                                                  # (1, L)
    s_chan = jnp.kron(wc.reshape(C, 1).astype(jnp.float32),
                      jnp.eye(L, dtype=jnp.float32))                    # (C*L, L): conv as matmul
    s_conv = block_diag(*([s_chan] * pack))                             # (pack*C*L, pack*L)
    w1_blk = block_diag(*([w1] * pack))                                 # (pack*L, pack*F)
    m_blk = block_diag(*([m_fold] * pack))                              # (pack*F, pack*L)
    w1b = jnp.concatenate([w1_blk, jnp.tile(b1.reshape(1, Fn), (1, pack))], axis=0)
    mbf = jnp.concatenate([m_blk, jnp.tile(b_fold.reshape(1, L), (1, pack))], axis=0)
    bc_s = bc.reshape(-1)[:1]                                           # (1,) SMEM scalar

    # ---- free row-major view: `pack` batch rows per lane-dense 512-wide row ----
    bp = _round_up(B, pack)    # pad only to the packing quantum (NOT to the block size);
    if bp != B:                # batches that are already a multiple of `pack` incur zero copies.
        x = jnp.pad(x, ((0, bp - B), (0, 0), (0, 0)))
    wide = pack * C * L
    lout = pack * L
    r_total = bp // pack
    xw = x.reshape(r_total, wide)                                       # free reshape, dense rows

    # Batch rows per block: big tiles amortize the ~0.35 us/step overhead; capped so the
    # "parallel" grid keeps >= ~8 steps for v7x's two TensorCores on large batches.  Tiles stay
    # well under v5e's 16 MiB scoped-VMEM default (4096-row x tile = 2 MiB, y tile = 0.5 MiB,
    # double-buffered, + ~0.3 MiB resident weights).
    bb = min(block_b, max(1024, _round_up(pl.cdiv(bp, 8), 8)))
    rb = max(8, (bb // pack // 8) * 8)
    if rb >= r_total:
        rb = r_total                                   # single block == full array dims
    grid = (pl.cdiv(r_total, rb),)                     # ragged last block is fine: garbage tail
                                                       # rows are computed then discarded (no
                                                       # cross-row reductions anywhere).

    flops = 2 * r_total * (wide * lout + lout * pack * Fn + pack * Fn * lout)
    bytes_accessed = 4 * (r_total * wide + r_total * lout
                          + s_conv.size + w1b.size + mbf.size + 1)

    out = pl.pallas_call(
        fcn_kernel,
        out_shape=jax.ShapeDtypeStruct((r_total, lout), jnp.float32),
        grid=grid,
        in_specs=[
            pl.BlockSpec(memory_space=pltpu.MemorySpace.SMEM),          # conv bias scalar
            pl.BlockSpec((rb, wide), lambda i: (i, 0)),                 # x, rows-in-lanes view
            pl.BlockSpec((pack * C * L, lout), lambda i: (0, 0)),       # conv/pack matrix (resident)
            pl.BlockSpec((pack * L + 1, pack * Fn), lambda i: (0, 0)),  # packed w1 | b1 (resident)
            pl.BlockSpec((pack * Fn + 1, lout), lambda i: (0, 0)),      # packed M | b_fold (resident)
        ],
        out_specs=pl.BlockSpec((rb, lout), lambda i: (i, 0)),
        compiler_params=pltpu.CompilerParams(
            dimension_semantics=("parallel",),          # shard batch blocks across v7x TCs
        ),
        cost_estimate=pl.CostEstimate(
            flops=flops, transcendentals=0, bytes_accessed=bytes_accessed),
    )(bc_s, xw, s_conv, w1b, mbf)

    # free reshape back to one row per sample; drop the (at most pack-1) padded rows.
    return out.reshape(bp, L)[:B]


def fcn_reference(x, params):
    """Pure-JAX reference mirroring the PyTorch forward (unfolded)."""
    wc, bc, w1, b1, w2, b2, ns_t = params
    conv = jnp.sum(x * wc[:, :, None], axis=1) + bc            # Conv1d(in_c, 1, 1)
    h = jax.nn.relu(conv)                                      # ReLU; Flatten no-op
    h1 = jax.nn.relu(h @ w1 + b1)                              # Linear + ReLU
    out = h1 @ w2 + b2                                         # final Linear
    return out @ ns_t                                          # matmul with nullspace.T


if __name__ == "__main__":
    # Small shapes consistent with the module:
    #   in_c=4, nullspace of shape (L=32, label_dim=1), num_filter=2, batch=2
    B, C, L = 2, 4, 32
    num_filter, label_dim = 2, 1

    key = jax.random.PRNGKey(0)
    ks = jax.random.split(key, 8)

    x = jax.random.normal(ks[0], (B, C, L), dtype=jnp.float32)

    nullspace = jax.random.normal(ks[1], (L, label_dim), dtype=jnp.float32)
    ns_t = nullspace.T                                                        # (label_dim, L)

    wc = jax.random.normal(ks[2], (1, C), dtype=jnp.float32) * 0.1            # Conv1d weight (1,in_c,1) squeezed
    bc = jax.random.normal(ks[3], (1, 1), dtype=jnp.float32) * 0.1            # Conv1d bias
    w1 = jax.random.normal(ks[4], (L, num_filter), dtype=jnp.float32) * 0.1   # Linear(L,F).weight.T
    b1 = jax.random.normal(ks[5], (1, num_filter), dtype=jnp.float32) * 0.1
    w2 = jax.random.normal(ks[6], (num_filter, label_dim), dtype=jnp.float32) * 0.1  # Linear(F,D).weight.T
    b2 = jax.random.normal(ks[7], (1, label_dim), dtype=jnp.float32) * 0.1

    params = (wc, bc, w1, b1, w2, b2, ns_t)

    y = fcn_forward(x, params)
    y = jax.block_until_ready(y)

    y_ref = fcn_reference(x, params)
    assert y.shape == (B, L), y.shape
    assert jnp.allclose(y, y_ref, atol=1e-5, rtol=1e-4), "Pallas kernel mismatch vs reference"

    print("KERNEL_OK")
</pallas_src>

<mosaic_0001>
module attributes {stable_mosaic.version = 11 : i64} {
  func.func @fcn_kernel(%arg0: i32, %arg1: memref<1xf32, #tpu.memory_space<smem>>, %arg2: memref<1x512xf32, #tpu.memory_space<vmem>>, %arg3: memref<512x128xf32, #tpu.memory_space<vmem>>, %arg4: memref<129x8xf32, #tpu.memory_space<vmem>>, %arg5: memref<9x128xf32, #tpu.memory_space<vmem>>, %arg6: memref<1x128xf32, #tpu.memory_space<vmem>>) attributes {dimension_semantics = [#tpu.dimension_semantics<parallel>], iteration_bounds = array<i64: 1>, scalar_prefetch = 0 : i64, scratch_operands = 0 : i64, tpu.core_type = #tpu.core_type<tc>, window_params = [{transform_indices = @transform_0, window_bounds = array<i64: 1>}, {transform_indices = @transform_1, window_bounds = array<i64: 1, 512>}, {pipeline_mode = #tpu.pipeline_mode<synchronous>, transform_indices = @transform_2, window_bounds = array<i64: 512, 128>}, {pipeline_mode = #tpu.pipeline_mode<synchronous>, transform_indices = @transform_3, window_bounds = array<i64: 129, 8>}, {pipeline_mode = #tpu.pipeline_mode<synchronous>, transform_indices = @transform_4, window_bounds = array<i64: 9, 128>}, {transform_indices = @transform_5, window_bounds = array<i64: 1, 128>}]} {
    %c0 = arith.constant 0 : index
    %c0_0 = arith.constant 0 : index
    %0 = vector.load %arg2[%c0, %c0_0] : memref<1x512xf32, #tpu.memory_space<vmem>>, vector<1x512xf32>
    %c0_1 = arith.constant 0 : index
    %c0_2 = arith.constant 0 : index
    %1 = vector.load %arg3[%c0_1, %c0_2] : memref<512x128xf32, #tpu.memory_space<vmem>>, vector<512x128xf32>
    %cst = arith.constant dense<0.000000e+00> : vector<1x128xf32>
    %2 = tpu.matmul %0, %1, %cst {dimension_numbers = #tpu.dot_dimension_numbers<[1], [0], [0], [1], [0, 0, 1, 1], [], []>} : vector<1x512xf32>, vector<512x128xf32>, vector<1x128xf32> -> vector<1x128xf32>
    %c0_3 = arith.constant 0 : index
    %3 = memref.load %arg1[%c0_3] : memref<1xf32, #tpu.memory_space<smem>>
    %4 = vector.broadcast %3 : f32 to vector<1x128xf32>
    %5 = arith.addf %2, %4 : vector<1x128xf32>
    %cst_4 = arith.constant 0.000000e+00 : f32
    %6 = vector.broadcast %cst_4 : f32 to vector<1x128xf32>
    %7 = arith.maximumf %5, %6 : vector<1x128xf32>
    %c0_5 = arith.constant 0 : index
    %c0_6 = arith.constant 0 : index
    %8 = vector.load %arg4[%c0_5, %c0_6] : memref<129x8xf32, #tpu.memory_space<vmem>>, vector<128x8xf32>
    %cst_7 = arith.constant dense<0.000000e+00> : vector<1x8xf32>
    %9 = tpu.matmul %7, %8, %cst_7 {dimension_numbers = #tpu.dot_dimension_numbers<[1], [0], [0], [1], [0, 0, 1, 1], [], []>} : vector<1x128xf32>, vector<128x8xf32>, vector<1x8xf32> -> vector<1x8xf32>
    %c128 = arith.constant 128 : index
    %c0_8 = arith.constant 0 : index
    %10 = vector.load %arg4[%c128, %c0_8] : memref<129x8xf32, #tpu.memory_space<vmem>>, vector<1x8xf32>
    %11 = arith.addf %9, %10 : vector<1x8xf32>
    %cst_9 = arith.constant 0.000000e+00 : f32
    %12 = vector.broadcast %cst_9 : f32 to vector<1x8xf32>
    %13 = arith.maximumf %11, %12 : vector<1x8xf32>
    %c0_10 = arith.constant 0 : index
    %c0_11 = arith.constant 0 : index
    %14 = vector.load %arg5[%c0_10, %c0_11] : memref<9x128xf32, #tpu.memory_space<vmem>>, vector<8x128xf32>
    %cst_12 = arith.constant dense<0.000000e+00> : vector<1x128xf32>
    %15 = tpu.matmul %13, %14, %cst_12 {dimension_numbers = #tpu.dot_dimension_numbers<[1], [0], [0], [1], [0, 0, 1, 1], [], []>} : vector<1x8xf32>, vector<8x128xf32>, vector<1x128xf32> -> vector<1x128xf32>
    %c8 = arith.constant 8 : index
    %c0_13 = arith.constant 0 : index
    %16 = vector.load %arg5[%c8, %c0_13] : memref<9x128xf32, #tpu.memory_space<vmem>>, vector<1x128xf32>
    %17 = arith.addf %15, %16 : vector<1x128xf32>
    %c0_14 = arith.constant 0 : index
    %c0_15 = arith.constant 0 : index
    %18 = vector.load %arg6[%c0_14, %c0_15] : memref<1x128xf32, #tpu.memory_space<vmem>>, vector<1x128xf32>
    tpu.vector_store %arg6[%c0_14, %c0_15], %17 {strides = array<i32>} : memref<1x128xf32, #tpu.memory_space<vmem>>, vector<1x128xf32>,
    return
  }
  func.func @transform_0(%arg0: i32) -> i32 {
    %c0_i32 = arith.constant 0 : i32
    %c0_i32_0 = arith.constant 0 : i32
    return %c0_i32 : i32
  }
  func.func @transform_1(%arg0: i32) -> (i32, i32) {
    %c0_i32 = arith.constant 0 : i32
    %c0_i32_0 = arith.constant 0 : i32
    return %arg0, %c0_i32 : i32, i32
  }
  func.func @transform_2(%arg0: i32) -> (i32, i32) {
    %c0_i32 = arith.constant 0 : i32
    %c0_i32_0 = arith.constant 0 : i32
    %c0_i32_1 = arith.constant 0 : i32
    return %c0_i32, %c0_i32_0 : i32, i32
  }
  func.func @transform_3(%arg0: i32) -> (i32, i32) {
    %c0_i32 = arith.constant 0 : i32
    %c0_i32_0 = arith.constant 0 : i32
    %c0_i32_1 = arith.constant 0 : i32
    return %c0_i32, %c0_i32_0 : i32, i32
  }
  func.func @transform_4(%arg0: i32) -> (i32, i32) {
    %c0_i32 = arith.constant 0 : i32
    %c0_i32_0 = arith.constant 0 : i32
    %c0_i32_1 = arith.constant 0 : i32
    return %c0_i32, %c0_i32_0 : i32, i32
  }
  func.func @transform_5(%arg0: i32) -> (i32, i32) {
    %c0_i32 = arith.constant 0 : i32
    %c0_i32_0 = arith.constant 0 : i32
    return %arg0, %c0_i32 : i32, i32
  }
}

</mosaic_0001>

<bundles_post_ra>
// kernel: fcn_forward.1
= control target key start
LH: loop header
LB: loop body
LE: loop exit
PB: predicated region body
PF: predicated region fallthrough
CT: control target
= control target key end

     0   :  { %v89_v47 = vlaneseq  ;;  %vm641_vm0 = vmmov 0   ;;  %vm340_vm1 = vcmask 64512   ;;  %s937_s2 = inlined_call_operand.vmem [shape: f32[512,128], index: 2, kind: input, shape index: {}]   ;;  %s938_s1 = inlined_call_operand.vmem [shape: f32[1,512], index: 1, kind: input, shape index: {}]   ;;  %s939_s3 = inlined_call_operand.vmem [shape: f32[129,8], index: 3, kind: input, shape index: {}]   ;;  %s940_s0 = inlined_call_operand.<no memory space> [shape: f32[1], index: 0, kind: input, shape index: {}]   ;;  %s941_s4 = inlined_call_operand.vmem [shape: f32[9,128], index: 4, kind: input, shape index: {}]   ;;  %s942_s5 = inlined_call_operand.vmem [shape: f32[1,128], index: 5, kind: output, shape index: {}]  }
   0x1   :  { %v38_v0 = vld [vmem:[%s937_s2 + $0x80] sm:$0xff]  ;;  %v39_v1 = vld [vmem:[%s937_s2 + $0x88] sm:$0xff]  ;;  %v40_v11 = vld [vmem:[%s937_s2 + $0x90] sm:$0xff] }
   0x2   :  { %v22_v2 = vld [vmem:[%s937_s2] sm:$0xff]  ;;  %v549_v3 = vpack.c.bf16 %v39_v1, %v38_v0  ;;  %v23_v4 = vld [vmem:[%s937_s2 + $0x8] sm:$0xff]  ;;  %v41_v13 = vld [vmem:[%s937_s2 + $0x98] sm:$0xff]  ;;  %v799_v61 = vshrl.u32 %v89_v47, 7 }
   0x3   :  { %v70_v5 = vld [vmem:[%s937_s2 + $0x180] sm:$0xff]  ;;  %v71_v6 = vld [vmem:[%s937_s2 + $0x188] sm:$0xff]  ;;  %v551_v7 = vpack.c.bf16 %v23_v4, %v22_v2  ;;  %v24_v14 = vld [vmem:[%s937_s2 + $0x10] sm:$0xff]  ;;  %v553_v16 = vpack.c.bf16 %v41_v13, %v40_v11 }
   0x4   :  { %v581_v8 = vpack.c.bf16 %v71_v6, %v70_v5  ;;  %v54_v9 = vld [vmem:[%s937_s2 + $0x100] sm:$0xff]  ;;  %v55_v10 = vld [vmem:[%s937_s2 + $0x108] sm:$0xff]  ;;  %550 = vmatprep.subr.bf16.mxu0 %v549_v3  ;;  %v25_v15 = vld [vmem:[%s937_s2 + $0x18] sm:$0xff]  ;;  %v103_v11 = vsub.s32 3, %v799_v61 }
   0x5   :  { %v583_v12 = vpack.c.bf16 %v55_v10, %v54_v9  ;;  %552 = vmatpush3.bf16.msra.mxu0 %v551_v7  ;;  %v555_v17 = vpack.c.bf16 %v25_v15, %v24_v14  ;;  %v72_v18 = vld [vmem:[%s937_s2 + $0x190] sm:$0xff]  ;;  %v73_v19 = vld [vmem:[%s937_s2 + $0x198] sm:$0xff]  ;;  %v42_v23 = vld [vmem:[%s937_s2 + $0xa0] sm:$0xff]  ;;  %v95_v10 = vsub.s32 1, %v799_v61 }
   0x6   :  { %582 = vmatprep.subr.bf16.mxu1 %v581_v8  ;;  %v56_v20 = vld [vmem:[%s937_s2 + $0x110] sm:$0xff]  ;;  %v585_v21 = vpack.c.bf16 %v73_v19, %v72_v18  ;;  %v57_v22 = vld [vmem:[%s937_s2 + $0x118] sm:$0xff]  ;;  %v43_v24 = vld [vmem:[%s937_s2 + $0xa8] sm:$0xff]  ;;  %554 = vmatprep.subr.bf16.mxu0 %v553_v16 }
   0x7   :  { %584 = vmatpush3.bf16.msra.mxu1 %v583_v12  ;;  %v587_v25 = vpack.c.bf16 %v57_v22, %v56_v20  ;;  %v557_v26 = vpack.c.bf16 %v43_v24, %v42_v23  ;;  %v26_v27 = vld [vmem:[%s937_s2 + $0x20] sm:$0xff]  ;;  %v27_v28 = vld [vmem:[%s937_s2 + $0x28] sm:$0xff]  ;;  %v44_v35 = vld [vmem:[%s937_s2 + $0xb0] sm:$0xff] }
   0x8   :  { %v74_v29 = vld [vmem:[%s937_s2 + $0x1a0] sm:$0xff]  ;;  %586 = vmatprep.subr.bf16.mxu1 %v585_v21  ;;  %v75_v30 = vld [vmem:[%s937_s2 + $0x1a8] sm:$0xff]  ;;  %v559_v33 = vpack.c.bf16 %v27_v28, %v26_v27  ;;  %v45_v36 = vld [vmem:[%s937_s2 + $0xb8] sm:$0xff] }
   0x9   :  { %v58_v31 = vld [vmem:[%s937_s2 + $0x120] sm:$0xff]  ;;  %v59_v32 = vld [vmem:[%s937_s2 + $0x128] sm:$0xff]  ;;  %556 = vmatpush3.bf16.msra.mxu0 %v555_v17  ;;  %v589_v34 = vpack.c.bf16 %v75_v30, %v74_v29  ;;  %v28_v37 = vld [vmem:[%s937_s2 + $0x30] sm:$0xff]  ;;  %v561_v39 = vpack.c.bf16 %v45_v36, %v44_v35 }
   0xa   :  { %558 = vmatprep.subr.bf16.mxu0 %v557_v26  ;;  %v591_v38 = vpack.c.bf16 %v59_v32, %v58_v31  ;;  %v29_v40 = vld [vmem:[%s937_s2 + $0x38] sm:$0xff]  ;;  %v76_v41 = vld [vmem:[%s937_s2 + $0x1b0] sm:$0xff]  ;;  %v46_v46 = vld [vmem:[%s937_s2 + $0xc0] sm:$0xff] }
   0xb   :  { %588 = vmatpush3.bf16.msra.mxu1 %v587_v25  ;;  %v77_v42 = vld [vmem:[%s937_s2 + $0x1b8] sm:$0xff]  ;;  %v60_v44 = vld [vmem:[%s937_s2 + $0x130] sm:$0xff]  ;;  %v47_v48 = vld [vmem:[%s937_s2 + $0xc8] sm:$0xff]  ;;  %v563_v49 = vpack.c.bf16 %v29_v40, %v28_v37  ;;  %v91_v37 = vsub.s32 0, %v799_v61 }
   0xc   :  { %590 = vmatprep.subr.bf16.mxu1 %v589_v34  ;;  %v593_v43 = vpack.c.bf16 %v77_v42, %v76_v41  ;;  %v61_v45 = vld [vmem:[%s937_s2 + $0x138] sm:$0xff]  ;;  %v78_v50 = vld [vmem:[%s937_s2 + $0x1c0] sm:$0xff]  ;;  %v79_v51 = vld [vmem:[%s937_s2 + $0x1c8] sm:$0xff]  ;;  %v565_v53 = vpack.c.bf16 %v47_v48, %v46_v46  ;;  %v640_v46 = vmov 0.0|0.0  }
   0xd   :  { %560 = vmatpush3.bf16.msra.mxu0 %v559_v33  ;;  %v595_v52 = vpack.c.bf16 %v61_v45, %v60_v44  ;;  %v30_v54 = vld [vmem:[%s937_s2 + $0x40] sm:$0xff]  ;;  %v31_v55 = vld [vmem:[%s937_s2 + $0x48] sm:$0xff]  ;;  %v597_v57 = vpack.c.bf16 %v79_v51, %v78_v50  ;;  %v48_v59 = vld [vmem:[%s937_s2 + $0xd0] sm:$0xff] }
   0xe   :  { %562 = vmatprep.subr.bf16.mxu0 %v561_v39  ;;  %v62_v56 = vld [vmem:[%s937_s2 + $0x140] sm:$0xff]  ;;  %v63_v58 = vld [vmem:[%s937_s2 + $0x148] sm:$0xff]  ;;  %v49_v60 = vld [vmem:[%s937_s2 + $0xd8] sm:$0xff]  ;;  %v567_v0 = vpack.c.bf16 %v31_v55, %v30_v54  ;;  %v99_v39 = vsub.s32 2, %v799_v61 }
   0xf   :  { %592 = vmatpush3.bf16.msra.mxu1 %v591_v38  ;;  %v80_v62 = vld [vmem:[%s937_s2 + $0x1d0] sm:$0xff]  ;;  %v81_v63 = vld [vmem:[%s937_s2 + $0x1d8] sm:$0xff]  ;;  %v599_v1 = vpack.c.bf16 %v63_v58, %v62_v56  ;;  %v569_v2 = vpack.c.bf16 %v49_v60, %v48_v59  ;;  %v50_v8 = vld [vmem:[%s937_s2 + $0xe0] sm:$0xff] }
  0x10   :  { %594 = vmatprep.subr.bf16.mxu1 %v593_v43  ;;  %v32_v3 = vld [vmem:[%s937_s2 + $0x50] sm:$0xff]  ;;  %v33_v4 = vld [vmem:[%s937_s2 + $0x58] sm:$0xff]  ;;  %v601_v6 = vpack.c.bf16 %v81_v63, %v80_v62  ;;  %v51_v9 = vld [vmem:[%s937_s2 + $0xe8] sm:$0xff] }
  0x11   :  { %564 = vmatpush3.bf16.msra.mxu0 %v563_v49  ;;  %v64_v5 = vld [vmem:[%s937_s2 + $0x150] sm:$0xff]  ;;  %v65_v7 = vld [vmem:[%s937_s2 + $0x158] sm:$0xff]  ;;  %v82_v12 = vld [vmem:[%s937_s2 + $0x1e0] sm:$0xff]  ;;  %v571_v14 = vpack.c.bf16 %v33_v4, %v32_v3  ;;  %v573_v17 = vpack.c.bf16 %v51_v9, %v50_v8  ;;  %v642_v4 = vmov 0.0  }
  0x12   :  { %566 = vmatprep.subr.bf16.mxu0 %v565_v53  ;;  %v83_v13 = vld [vmem:[%s937_s2 + $0x1e8] sm:$0xff]  ;;  %v34_v15 = vld [vmem:[%s937_s2 + $0x60] sm:$0xff]  ;;  %v603_v16 = vpack.c.bf16 %v65_v7, %v64_v5  ;;  %v52_v23 = vld [vmem:[%s937_s2 + $0xf0] sm:$0xff] }
  0x13   :  { %596 = vmatpush3.bf16.msra.mxu1 %v595_v52  ;;  %v35_v18 = vld [vmem:[%s937_s2 + $0x68] sm:$0xff]  ;;  %v66_v19 = vld [vmem:[%s937_s2 + $0x160] sm:$0xff]  ;;  %v605_v21 = vpack.c.bf16 %v83_v13, %v82_v12  ;;  %v53_v24 = vld [vmem:[%s937_s2 + $0xf8] sm:$0xff] }
  0x14   :  { %598 = vmatprep.subr.bf16.mxu1 %v597_v57  ;;  %v21_v20 = vld [vmem:[%s938_s1] sm:$0xf]  ;;  %v67_v22 = vld [vmem:[%s937_s2 + $0x168] sm:$0xff]  ;;  %v84_v27 = vld [vmem:[%s937_s2 + $0x1f0] sm:$0xff]  ;;  %v575_v29 = vpack.c.bf16 %v35_v18, %v34_v15  ;;  %v577_v31 = vpack.c.bf16 %v53_v24, %v52_v23 }
  0x15   :  { %568 = vmatpush3.bf16.msra.mxu0 %v567_v0  ;;  %v96_v25 = vrot.slane %v21_v20, %v95_v10  ;;  %v104_v26 = vrot.slane %v21_v20, %v103_v11  ;;  %v85_v28 = vld [vmem:[%s937_s2 + $0x1f8] sm:$0xff]  ;;  %v607_v30 = vpack.c.bf16 %v67_v22, %v66_v19  ;;  %v36_v32 = vld [vmem:[%s937_s2 + $0x70] sm:$0xff]  ;;  %v250_v41 = vld [vmem:[%s939_s3] sm:$0xff]  ;;  %v92_v43 = vrot.slane %v21_v20, %v91_v37 }
  0x16   :  { %570 = vmatprep.subr.bf16.mxu0 %v569_v2  ;;  %v37_v33 = vld [vmem:[%s937_s2 + $0x78] sm:$0xff]  ;;  %v609_v34 = vpack.c.bf16 %v85_v28, %v84_v27  ;;  %v68_v35 = vld [vmem:[%s937_s2 + $0x170] sm:$0xff]  ;;  %v251_v42 = vld [vmem:[%s939_s3 + $0x8] sm:$0xff]  ;;  %v100_v44 = vrot.slane %v21_v20, %v99_v39 }
  0x17   :  { %600 = vmatpush3.bf16.msra.mxu1 %v599_v1  ;;  %173 = vmatprep.mubr.f32.mxu0 %v96_v25  ;;  %v69_v36 = vld [vmem:[%s937_s2 + $0x178] sm:$0xff]  ;;  %v579_v38 = vpack.c.bf16 %v37_v33, %v36_v32  ;;  %v614_v45 = vpack.c.bf16 %v251_v42, %v250_v41  ;;  %v252_v47 = vld [vmem:[%s939_s3 + $0x10] sm:$0xff]  ;;  %v254_v50 = vld [vmem:[%s939_s3 + $0x20] sm:$0xff] }
  0x18   :  { %602 = vmatprep.subr.bf16.mxu1 %v601_v6  ;;  %243 = vmatprep.mubr.f32.mxu1 %v104_v26  ;;  %v611_v40 = vpack.c.bf16 %v69_v36, %v68_v35  ;;  %v253_v48 = vld [vmem:[%s939_s3 + $0x18] sm:$0xff]  ;;  %v255_v51 = vld [vmem:[%s939_s3 + $0x28] sm:$0xff]  ;;  %v256_v53 = vld [vmem:[%s939_s3 + $0x30] sm:$0xff]  ;;  %v87_v6 = vstv %s940_s0 }
  0x19   :  { %572 = vmatpush3.bf16.msra.mxu0 %v571_v14  ;;  %v617_v49 = vpack.c.bf16 %v253_v48, %v252_v47  ;;  %v620_v52 = vpack.c.bf16 %v255_v51, %v254_v50  ;;  %v257_v54 = vld [vmem:[%s939_s3 + $0x38] sm:$0xff]  ;;  %v258_v56 = vld [vmem:[%s939_s3 + $0x40] sm:$0xff]  ;;  %v259_v57 = vld [vmem:[%s939_s3 + $0x48] sm:$0xff] }
  0x1a   :  { %574 = vmatprep.subr.bf16.mxu0 %v573_v17  ;;  %v623_v55 = vpack.c.bf16 %v257_v54, %v256_v53  ;;  %v626_v58 = vpack.c.bf16 %v259_v57, %v258_v56  ;;  %v260_v59 = vld [vmem:[%s939_s3 + $0x50] sm:$0xff]  ;;  %v261_v60 = vld [vmem:[%s939_s3 + $0x58] sm:$0xff]  ;;  %v262_v62 = vld [vmem:[%s939_s3 + $0x60] sm:$0xff] }
  0x1b   :  { %604 = vmatpush3.bf16.msra.mxu1 %v603_v16  ;;  %v629_v61 = vpack.c.bf16 %v261_v60, %v260_v59  ;;  %v263_v63 = vld [vmem:[%s939_s3 + $0x68] sm:$0xff]  ;;  %v264_v1 = vld [vmem:[%s939_s3 + $0x70] sm:$0xff]  ;;  %v265_v2 = vld [vmem:[%s939_s3 + $0x78] sm:$0xff] }
  0x1c   :  { %606 = vmatprep.subr.bf16.mxu1 %v605_v21  ;;  %v632_v0 = vpack.c.bf16 %v263_v63, %v262_v62  ;;  %v635_v3 = vpack.c.bf16 %v265_v2, %v264_v1  ;;  %v338_v15 = vld [vmem:[%s941_s4] sm:$0xff]  ;;  %v339_v21 = vld [vmem:[%s941_s4 + $0x8] sm:$0x1] }
  0x1d   :  { %576 = vmatpush3.bf16.msra.mxu0 %v575_v29  ;;  %v266_v16 = vld [vmem:[%s939_s3 + $0x80] sm:$0x1] }
  0x1e   :  { %578 = vmatprep.subr.bf16.mxu0 %v577_v31 }
  0x1f   :  { %608 = vmatpush3.bf16.msra.mxu1 %v607_v30 }
  0x20   :  { %610 = vmatprep.subr.bf16.mxu1 %v609_v34 }
  0x21   :  { %580 = vmatpush3.bf16.msra.mxu0 %v579_v38 }
  0x22   :  { %613 = vmatprep.subr.bf16.mxu0 %v640_v46 }
  0x23   :  { %612 = vmatpush3.bf16.msra.mxu1 %v611_v40 }
  0x24   :  { %174 = vmatmul.mubr.f32.vlgmr.msra.gmra.mrb[0].mxu0 %v92_v43  ;;  %544 = vmatprep.subr.mxu1 %v642_v4 }
  0x25   :  { %615 = vmatpush3.bf16.msra.mxu0 %v614_v45  ;;  %541 = vmatprep.mubr.msk.f32.mxu0 %vm641_vm0, %v642_v4 }
  0x26   :  { %244 = vmatmul.mubr.f32.vlgmr.msra.gmra.mrb[0].mxu1 %v100_v44  ;;  %616 = vmatprep.subr.bf16.mxu0 %v640_v46 }
  0x27   :  { %546 = vmatprep.mubr.msk.f32.mxu1 %vm641_vm0, %v642_v4  ;;  %545 = vmatpush3.msra.mxu1 %v338_v15 }
  0x29   :  { %618 = vmatpush3.bf16.msra.mxu0 %v617_v49 }
  0x2a   :  { %619 = vmatprep.subr.bf16.mxu0 %v640_v46 }
  0x2d   :  { %621 = vmatpush3.bf16.msra.mxu0 %v620_v52 }
  0x2e   :  { %622 = vmatprep.subr.bf16.mxu0 %v640_v46 }
  0x31   :  { %624 = vmatpush3.bf16.msra.mxu0 %v623_v55 }
  0x32   :  { %625 = vmatprep.subr.bf16.mxu0 %v640_v46 }
  0x35   :  { %627 = vmatpush3.bf16.msra.mxu0 %v626_v58 }
  0x36   :  { %628 = vmatprep.subr.bf16.mxu0 %v640_v46 }
  0x39   :  { %630 = vmatpush3.bf16.msra.mxu0 %v629_v61 }
  0x3a   :  { %631 = vmatprep.subr.bf16.mxu0 %v640_v46 }
  0x3d   :  { %633 = vmatpush3.bf16.msra.mxu0 %v632_v0 }
  0x3e   :  { %634 = vmatprep.subr.bf16.mxu0 %v640_v46 }
  0x41   :  { %636 = vmatpush3.bf16.msra.mxu0 %v635_v3 }
  0xf7   :  { %v452_v5 = vpop.f32.mrb[0].mxu0 }
  0xf8   :  { %v453_v7 = vpop.f32.mrb[1].mxu0 }
  0xf9   :  { %v487_v8 = vpop.f32.mrb[0].mxu1  ;;  %v454_v9 = vadd.f32 %v453_v7, %v452_v5 }
  0xfa   :  { %v488_v10 = vpop.f32.mrb[1].mxu1 }
  0xfb   :  { %v489_v11 = vadd.f32 %v488_v10, %v487_v8  ;;  %v176_v12 = vadd.f32 %v454_v9, %v87_v6 }
  0xfd   :  { %v246_v13 = vadd.f32 %v489_v11, %v176_v12 }
  0xff   :  { %v249_v14 = vmax.f32 %v246_v13, 0.0 }
 0x101   :  { %542 = vmatmul.mubr.f32.vlgmr.msra.gmra.mrb[2].mxu0 %v249_v14 }
 0x1d4   :  { %v333_v17 = vpop.f32.mrb[2].mxu0 }
 0x1d5   :  { %v334_v18 = vadd.f32 %v333_v17, %v266_v16  ;;  %v543_v19 = vpop.f32.mrb[3].mxu0 }
 0x1d7   :  { %v337_v20 = vmax.f32 %v334_v18, 0.0 }
 0x1d9   :  { %547 = vmatmul.mubr.msk.f32.vlgmr.msra.gmra.mrb[2].mxu1 %vm340_vm1, %v337_v20 }
 0x2ac   :  { %v410_v22 = vpop.f32.mrb[2].mxu1 }
 0x2ad   :  { %v411_v23 = vadd.f32 %v410_v22, %v339_v21  ;;  %v548_v24 = vpop.f32.mrb[3].mxu1 }
 0x2af   :  { %414 = vst [vmem:[%s942_s5] sm:$0x1] %v411_v23 }

</bundles_post_ra>
